<compile_context>
chip_gen: v5e
topology: v5e:2x2
jax: 0.10.0
libtpu: 0.0.40
codegen_flags: <defaults>
</compile_context>

<pallas_src>
import jax
import jax.numpy as jnp
from jax.experimental import pallas as pl
from jax.experimental.pallas import tpu as pltpu


def _round_up(x, m):
    return ((x + m - 1) // m) * m


_FALLBACK_VMEM_LIMIT = 48 * 1024 * 1024  # safe on every generation (v7x: 64 MiB phys)


def _vmem_limit_bytes():
    """Generation-aware scoped-VMEM request: physical capacity minus headroom."""
    cap = None
    try:
        cap = int(getattr(pltpu.get_tpu_info(), "vmem_capacity_bytes", 0)) or None
    except Exception:
        cap = None
    if cap is None:
        return _FALLBACK_VMEM_LIMIT
    # Leave ~16 MiB for compiler internal scratch/spills; never ask for > 100 MiB.
    return max(16 * 1024 * 1024, min(cap - 16 * 1024 * 1024, 100 * 1024 * 1024))


def _make_biaffine_kernel(tc, Dp, precision):
    """tc: classes per class-tile; Dp: 128-padded feature width."""

    def kernel(x_ref, w_ref, s_ref, b_ref, o_ref, y_ref):
        ci = pl.program_id(1)   # class-tile index (innermost, "arbitrary" axis)

        # Output block is resident across the class axis; initialize it once per
        # token tile with the broadcast bias, then accumulate class-tile partials.
        @pl.when(ci == 0)
        def _init():
            o_ref[...] = jnp.zeros_like(o_ref) + b_ref[...]      # (tn, Cp) <- (1, Cp)

        x = x_ref[...]                                            # (tn, Dp) bf16/f32
        # 1) fused matmul for all classes of this class tile (MXU, f32 accumulation)
        xw = jnp.dot(x, w_ref[...],
                     preferred_element_type=jnp.float32,
                     precision=precision)                         # (tn, tc*Dp) f32
        # 2) per-class bilinear elementwise product, written with static 128-aligned
        #    lane slices into VMEM scratch (no concatenate / x replication).
        xf = x.astype(jnp.float32)
        for c in range(tc):
            y_ref[:, c * Dp:(c + 1) * Dp] = xw[:, c * Dp:(c + 1) * Dp] * xf
        # 3) per-class reduction as a second MXU matmul against the 0/1 selector:
        #    lane-dense (tn, Cp) partial, accumulated into the resident output block.
        o_ref[...] += jnp.dot(y_ref[...], s_ref[...],
                              preferred_element_type=jnp.float32,
                              precision=precision)

    return kernel


def biaffine_forward(x, W, b, *, token_tile=512, use_bf16_matmul=True, precision=None):
    """x: (B, S, D); W: (C, D, D); b: (C,) -> scores (B, S, C) float32.

    use_bf16_matmul=True (default): MXU inputs in bf16, accumulation in f32 — expect
    ~1e-3 relative error versus a float64/strict-f32 reference.  Set False (and
    optionally precision=jax.lax.Precision.HIGHEST) for a tight f32 path.
    """
    B, S, D = x.shape
    C = W.shape[0]
    N = B * S
    f32 = jnp.float32
    in_dt = jnp.bfloat16 if use_bf16_matmul else f32
    dw = 2 if use_bf16_matmul else 4

    Dp = _round_up(max(D, 1), 128)     # feature dim padded to full 128-lane width
    Cp = _round_up(max(C, 1), 128)     # lane-dense output class width

    vmem_limit = _vmem_limit_bytes()

    # --- class tiling: keep per-step W2 / selector blocks modest so large C*D configs
    #     are streamed across an "arbitrary" grid axis instead of held fully resident.
    w2_block_budget = vmem_limit // 6
    sel_block_budget = vmem_limit // 12
    tc = max(1, min(C,
                    w2_block_budget // (Dp * Dp * dw),
                    sel_block_budget // (Dp * Cp * 4)))
    Ct = _round_up(C, tc)
    n_ct = Ct // tc
    consts_resident = (n_ct == 1)      # constant index maps -> fetched once

    # --- token tiling: big tile to amortize ~0.35us/step, but at least 2 grid steps
    #     (when N allows) so the "parallel" axis shards across both v7x TensorCores.
    tn = max(8, min(int(token_tile), _round_up(max(1, -(-N // 2)), 8)))
    n_cbuf = 1 if consts_resident else 2
    const_bytes = (Dp * tc * Dp * dw + tc * Dp * Cp * 4) * n_cbuf + Cp * 4
    while tn > 8:
        stream_bytes = (2 * tn * Dp * dw          # x (double-buffered)
                        + 2 * tn * Cp * 4         # output (double-buffered)
                        + 2 * tn * tc * Dp * 4)   # y scratch + xw temporary
        if const_bytes + stream_bytes <= int(0.7 * vmem_limit):
            break
        tn = max(8, _round_up(tn // 2, 8))
    Npad = _round_up(N, tn)

    # --- wrapper-side layout plumbing (exact: zero padding only) ---
    x2d = x.reshape(N, D).astype(in_dt)
    if (Npad, Dp) == (N, D):
        x_in = x2d
    else:
        x_in = jnp.zeros((Npad, Dp), in_dt).at[:N, :D].set(x2d)

    # W2[j, c*Dp + k] = W[c, j, k]  (zero-padded classes/features)
    W_pad = jnp.zeros((Ct, Dp, Dp), f32).at[:C, :D, :D].set(W.astype(f32))
    W2 = jnp.transpose(W_pad, (1, 0, 2)).reshape(Dp, Ct * Dp).astype(in_dt)

    # Selector: S[c*Dp + k, c] = 1 for real classes; padded classes/columns stay zero.
    sel = jnp.zeros((Ct, Cp), f32).at[:C, :C].set(jnp.eye(C, dtype=f32))
    S_mat = jnp.repeat(sel, Dp, axis=0)                            # (Ct*Dp, Cp) f32

    b_row = jnp.zeros((1, Cp), f32).at[0, :C].set(b.astype(f32))

    grid = (Npad // tn, n_ct)

    def _spec(shape, index_map, single_buffer):
        # Single-buffer grid-invariant operands (no per-step re-DMA -> 1 buffer is
        # enough and halves their VMEM residency).
        if single_buffer:
            return pl.BlockSpec(shape, index_map, pipeline_mode=pl.Buffered(1))
        return pl.BlockSpec(shape, index_map)

    cost = pl.CostEstimate(
        flops=2 * Npad * Dp * (Ct * Dp) + 2 * Npad * (Ct * Dp) * Cp,
        transcendentals=0,
        bytes_accessed=(Npad * Dp * dw           # streamed X
                        + Dp * Ct * Dp * dw      # fused weights (fetched once)
                        + Ct * Dp * Cp * 4       # selector (fetched once)
                        + Cp * 4                 # bias
                        + Npad * Cp * 4),        # output writeback
    )

    out = pl.pallas_call(
        _make_biaffine_kernel(tc, Dp, precision),
        out_shape=jax.ShapeDtypeStruct((Npad, Cp), f32),
        grid=grid,
        in_specs=[
            pl.BlockSpec((tn, Dp), lambda n, c: (n, 0)),                    # X tile
            _spec((Dp, tc * Dp), lambda n, c: (0, c), consts_resident),     # W2 slice
            _spec((tc * Dp, Cp), lambda n, c: (c, 0), consts_resident),     # selector
            _spec((1, Cp), lambda n, c: (0, 0), True),                      # bias row
        ],
        out_specs=pl.BlockSpec((tn, Cp), lambda n, c: (n, 0)),
        scratch_shapes=[pltpu.VMEM((tn, tc * Dp), f32)],                    # y scratch
        compiler_params=pltpu.CompilerParams(
            dimension_semantics=("parallel", "arbitrary"),
            vmem_limit_bytes=vmem_limit,
        ),
        cost_estimate=cost,
    )(x_in, W2, S_mat, b_row)

    return out[:N, :C].reshape(B, S, C)


if __name__ == "__main__":
    # Small shapes consistent with the module: batch=2, seq=8, input_dim=32, classes=4
    B, S, D, C = 2, 8, 32, 4

    key = jax.random.PRNGKey(0)
    kx, kw, kb = jax.random.split(key, 3)
    x = jax.random.normal(kx, (B, S, D), dtype=jnp.float32)
    # deterministic parameter init (stands in for nn.Parameter(torch.randn(...)))
    W = jax.random.normal(kw, (C, D, D), dtype=jnp.float32)
    b = jax.random.normal(kb, (C,), dtype=jnp.float32)

    # pure-JAX reference
    ref = jnp.einsum("bsi,cij,bsj->bsc", x, W, x) + b

    # 1) default path: bf16 MXU inputs, f32 accumulation (loose tolerance)
    scores_bf16 = jax.block_until_ready(biaffine_forward(x, W, b))
    assert scores_bf16.shape == (B, S, C)
    assert scores_bf16.dtype == jnp.float32
    err_bf16 = float(jnp.max(jnp.abs(scores_bf16 - ref)))
    assert jnp.allclose(scores_bf16, ref, rtol=5e-2, atol=5e-1), err_bf16

    # 2) f32 path: tight tolerance (matches the module's f32 semantics closely)
    scores_f32 = jax.block_until_ready(
        biaffine_forward(x, W, b, use_bf16_matmul=False))
    err_f32 = float(jnp.max(jnp.abs(scores_f32 - ref)))
    assert jnp.allclose(scores_f32, ref, rtol=1e-4, atol=1e-4), err_f32

    print("KERNEL_OK")
</pallas_src>

<mosaic_0001>
module attributes {stable_mosaic.version = 11 : i64} {
  func.func @kernel(%arg0: i32, %arg1: i32, %arg2: memref<8x128xbf16, #tpu.memory_space<vmem>>, %arg3: memref<128x512xbf16, #tpu.memory_space<vmem>>, %arg4: memref<512x128xf32, #tpu.memory_space<vmem>>, %arg5: memref<1x128xf32, #tpu.memory_space<vmem>>, %arg6: memref<8x128xf32, #tpu.memory_space<vmem>>, %arg7: memref<8x512xf32, #tpu.memory_space<vmem>>) attributes {dimension_semantics = [#tpu.dimension_semantics<parallel>, #tpu.dimension_semantics<arbitrary>], iteration_bounds = array<i64: 2, 1>, scalar_prefetch = 0 : i64, scratch_operands = 1 : i64, tpu.core_type = #tpu.core_type<tc>, window_params = [{transform_indices = @transform_0, window_bounds = array<i64: 8, 128>}, {pipeline_mode = #tpu.pipeline_mode<synchronous>, transform_indices = @transform_1, window_bounds = array<i64: 128, 512>}, {pipeline_mode = #tpu.pipeline_mode<synchronous>, transform_indices = @transform_2, window_bounds = array<i64: 512, 128>}, {pipeline_mode = #tpu.pipeline_mode<synchronous>, transform_indices = @transform_3, window_bounds = array<i64: 1, 128>}, {transform_indices = @transform_4, window_bounds = array<i64: 8, 128>}]} {
    %c0_i32 = arith.constant 0 : i32
    %0 = arith.cmpi eq, %arg1, %c0_i32 : i32
    %1 = arith.extui %0 : i1 to i32
    %c0_i32_0 = arith.constant 0 : i32
    %2 = arith.cmpi ne, %1, %c0_i32_0 : i32
    scf.if %2 {
      %cst_18 = arith.constant 0.000000e+00 : f32
      %25 = vector.broadcast %cst_18 : f32 to vector<8x128xf32>
      %c0_19 = arith.constant 0 : index
      %c0_20 = arith.constant 0 : index
      %26 = vector.load %arg5[%c0_19, %c0_20] : memref<1x128xf32, #tpu.memory_space<vmem>>, vector<1x128xf32>
      %27 = vector.broadcast %26 : vector<1x128xf32> to vector<8x128xf32>
      %28 = arith.addf %25, %27 : vector<8x128xf32>
      %c0_21 = arith.constant 0 : index
      %c0_22 = arith.constant 0 : index
      %29 = vector.load %arg6[%c0_21, %c0_22] : memref<8x128xf32, #tpu.memory_space<vmem>>, vector<8x128xf32>
      tpu.vector_store %arg6[%c0_21, %c0_22], %28 {strides = array<i32>} : memref<8x128xf32, #tpu.memory_space<vmem>>, vector<8x128xf32>,
    } else {
    }
    %c0 = arith.constant 0 : index
    %c0_1 = arith.constant 0 : index
    %3 = vector.load %arg2[%c0, %c0_1] : memref<8x128xbf16, #tpu.memory_space<vmem>>, vector<8x128xbf16>
    %c0_2 = arith.constant 0 : index
    %c0_3 = arith.constant 0 : index
    %4 = vector.load %arg3[%c0_2, %c0_3] : memref<128x512xbf16, #tpu.memory_space<vmem>>, vector<128x512xbf16>
    %cst = arith.constant dense<0.000000e+00> : vector<8x512xf32>
    %5 = tpu.matmul %3, %4, %cst {dimension_numbers = #tpu.dot_dimension_numbers<[1], [0], [0], [1], [0, 0, 1, 1], [], []>} : vector<8x128xbf16>, vector<128x512xbf16>, vector<8x512xf32> -> vector<8x512xf32>
    %6 = arith.extf %3 : vector<8x128xbf16> to vector<8x128xf32>
    %7 = vector.extract_strided_slice %5 {offsets = [0, 0], sizes = [8, 128], strides = [1, 1]} : vector<8x512xf32> to vector<8x128xf32>
    %8 = arith.mulf %7, %6 : vector<8x128xf32>
    %c0_4 = arith.constant 0 : index
    %c0_5 = arith.constant 0 : index
    %9 = vector.load %arg7[%c0_4, %c0_5] : memref<8x512xf32, #tpu.memory_space<vmem>>, vector<8x128xf32>
    tpu.vector_store %arg7[%c0_4, %c0_5], %8 {strides = array<i32>} : memref<8x512xf32, #tpu.memory_space<vmem>>, vector<8x128xf32>,
    %10 = vector.extract_strided_slice %5 {offsets = [0, 128], sizes = [8, 128], strides = [1, 1]} : vector<8x512xf32> to vector<8x128xf32>
    %11 = arith.mulf %10, %6 : vector<8x128xf32>
    %c0_6 = arith.constant 0 : index
    %c128 = arith.constant 128 : index
    %12 = vector.load %arg7[%c0_6, %c128] : memref<8x512xf32, #tpu.memory_space<vmem>>, vector<8x128xf32>
    tpu.vector_store %arg7[%c0_6, %c128], %11 {strides = array<i32>} : memref<8x512xf32, #tpu.memory_space<vmem>>, vector<8x128xf32>,
    %13 = vector.extract_strided_slice %5 {offsets = [0, 256], sizes = [8, 128], strides = [1, 1]} : vector<8x512xf32> to vector<8x128xf32>
    %14 = arith.mulf %13, %6 : vector<8x128xf32>
    %c0_7 = arith.constant 0 : index
    %c256 = arith.constant 256 : index
    %15 = vector.load %arg7[%c0_7, %c256] : memref<8x512xf32, #tpu.memory_space<vmem>>, vector<8x128xf32>
    tpu.vector_store %arg7[%c0_7, %c256], %14 {strides = array<i32>} : memref<8x512xf32, #tpu.memory_space<vmem>>, vector<8x128xf32>,
    %16 = vector.extract_strided_slice %5 {offsets = [0, 384], sizes = [8, 128], strides = [1, 1]} : vector<8x512xf32> to vector<8x128xf32>
    %17 = arith.mulf %16, %6 : vector<8x128xf32>
    %c0_8 = arith.constant 0 : index
    %c384 = arith.constant 384 : index
    %18 = vector.load %arg7[%c0_8, %c384] : memref<8x512xf32, #tpu.memory_space<vmem>>, vector<8x128xf32>
    tpu.vector_store %arg7[%c0_8, %c384], %17 {strides = array<i32>} : memref<8x512xf32, #tpu.memory_space<vmem>>, vector<8x128xf32>,
    %c0_9 = arith.constant 0 : index
    %c0_10 = arith.constant 0 : index
    %19 = vector.load %arg6[%c0_9, %c0_10] : memref<8x128xf32, #tpu.memory_space<vmem>>, vector<8x128xf32>
    %c0_11 = arith.constant 0 : index
    %c0_12 = arith.constant 0 : index
    %20 = vector.load %arg7[%c0_11, %c0_12] : memref<8x512xf32, #tpu.memory_space<vmem>>, vector<8x512xf32>
    %c0_13 = arith.constant 0 : index
    %c0_14 = arith.constant 0 : index
    %21 = vector.load %arg4[%c0_13, %c0_14] : memref<512x128xf32, #tpu.memory_space<vmem>>, vector<512x128xf32>
    %cst_15 = arith.constant dense<0.000000e+00> : vector<8x128xf32>
    %22 = tpu.matmul %20, %21, %cst_15 {dimension_numbers = #tpu.dot_dimension_numbers<[1], [0], [0], [1], [0, 0, 1, 1], [], []>} : vector<8x512xf32>, vector<512x128xf32>, vector<8x128xf32> -> vector<8x128xf32>
    %23 = arith.addf %19, %22 : vector<8x128xf32>
    %c0_16 = arith.constant 0 : index
    %c0_17 = arith.constant 0 : index
    %24 = vector.load %arg6[%c0_16, %c0_17] : memref<8x128xf32, #tpu.memory_space<vmem>>, vector<8x128xf32>
    tpu.vector_store %arg6[%c0_16, %c0_17], %23 {strides = array<i32>} : memref<8x128xf32, #tpu.memory_space<vmem>>, vector<8x128xf32>,
    return
  }
  func.func @transform_0(%arg0: i32, %arg1: i32) -> (i32, i32) {
    %c0_i32 = arith.constant 0 : i32
    %c0_i32_0 = arith.constant 0 : i32
    return %arg0, %c0_i32 : i32, i32
  }
  func.func @transform_1(%arg0: i32, %arg1: i32) -> (i32, i32) {
    %c0_i32 = arith.constant 0 : i32
    %c0_i32_0 = arith.constant 0 : i32
    return %c0_i32, %arg1 : i32, i32
  }
  func.func @transform_2(%arg0: i32, %arg1: i32) -> (i32, i32) {
    %c0_i32 = arith.constant 0 : i32
    %c0_i32_0 = arith.constant 0 : i32
    return %arg1, %c0_i32 : i32, i32
  }
  func.func @transform_3(%arg0: i32, %arg1: i32) -> (i32, i32) {
    %c0_i32 = arith.constant 0 : i32
    %c0_i32_0 = arith.constant 0 : i32
    %c0_i32_1 = arith.constant 0 : i32
    return %c0_i32, %c0_i32_0 : i32, i32
  }
  func.func @transform_4(%arg0: i32, %arg1: i32) -> (i32, i32) {
    %c0_i32 = arith.constant 0 : i32
    %c0_i32_0 = arith.constant 0 : i32
    return %arg0, %c0_i32 : i32, i32
  }
}

</mosaic_0001>

<bundles_post_ra>
// kernel: tpu_custom_call.1
= control target key start
LH: loop header
LB: loop body
LE: loop exit
PB: predicated region body
PF: predicated region fallthrough
CT: control target
= control target key end

     0   :  { %9 = vsyncpa [#allocation4], 0  ;;  %s1442_s0 = inlined_call_operand.hbm [shape: bf16[16,128], index: 0, kind: input, shape index: {}]   ;;  %s1443_s1 = inlined_call_operand.hbm [shape: bf16[128,512], index: 1, kind: input, shape index: {}]   ;;  %s1444_s2 = inlined_call_operand.hbm [shape: f32[512,128], index: 2, kind: input, shape index: {}]   ;;  %s1445_s3 = inlined_call_operand.vmem [shape: f32[1,128], index: 3, kind: input, shape index: {}]   ;;  %s1446_s4 = inlined_call_operand.hbm [shape: f32[16,128], index: 4, kind: output, shape index: {}]  }
   0x1   :  { %11 = vsyncpa [#allocation4 + $0x1], 0 }
   0x2   :  { %12 = vsyncpa [#allocation7], 0 }
   0x3   :  { %13 = vsyncpa [#allocation5], 0 }
   0x4   :  { %15 = vsyncpa [#allocation5 + $0x1], 0  ;;  %s1284_s15 = smov 0   ;;  %s1286_s16 = smov 0  }
   0x5   :  { %s1288_s17 = smov 0   ;;  %s1290_s18 = smov 0  }
   0x6   :  { %s1292_s19 = smov 0   ;;  %s1294_s20 = smov 0  }
   0x7 LB: > { %s810_s21 = sadd.s32 4294967295, %s1251_s20   ;;  %p812_p0 = scmp.ge.s32.totalorder %s1251_s20, 1  ;;  %s1251_s20 = sphi %s1294_s20, %s21_s20   ;;  %s1247_s19 = sphi %s1292_s19, %s1456_s19   ;;  %s1243_s18 = sphi %s1290_s18, %s1455_s18   ;;  %s1239_s17 = sphi %s1288_s17, %s1454_s17   ;;  %s1235_s16 = sphi %s1286_s16, %s1453_s16   ;;  %s1231_s15 = sphi %s1284_s15, %s1452_s15  }
   0x8   : > { %p1318_p1 = scmp.eq.s32.totalorder %s810_s21, 0  ;;  %p163_p2 = scmp.lt.s32.totalorder %s1251_s20, 3 }
   0x9   : > { %s177_s25 = sshll.u32 %s1443_s1, 4  ;;  %s1253_s27 = smov [#allocation6]   ;;  %s178_s25 = int_to_ptr.hbm [resolvable:$true] %s177_s25 }
   0xa   : > { %p1326_p3 = pnand %p812_p0, %p163_p2  ;;  %s179_s28 = sshll.u32 %s1253_s27, 4  ;;  %s180_s28 = int_to_ptr.vmem [resolvable:$true] %s179_s28 }
   0xb   : > { %p815_p6 = scmp.ge.s32.totalorder %s1251_s20, 2  ;;  %s194_s5 = sshll.u32 %s1444_s2, 4  ;;  %s195_s5 = int_to_ptr.hbm [resolvable:$true] %s194_s5 }
   0xc   : > { %p999_p4 = pneg %p1326_p3  ;;  %s1254_s6 = smov 256  }
   0xd   : > { %s1255_s7 = smov 16   ;;  %s1256_s8 = smov [#allocation8]  }
   0xe   : > { %p1000_p5 = pnand %p999_p4, %p1318_p1  ;;  %s196_s9 = sshll.u32 %s1256_s8, 4  ;;  %s197_s9 = int_to_ptr.vmem [resolvable:$true] %s196_s9 }
   0xf   : > { %s1257_s10 = smov 128   ;;  %s1258_s11 = smov 8  }
  0x10   : > { %1002 = dma.hbm_to_vmem [thread:$0]  (!%p1000_p5), %s178_s25, 4096, %s180_s28, [#allocation7], %s1254_s6, %s1254_s6, %s1255_s7  }
  0x11   : > { %1005 = dma.hbm_to_vmem [thread:$0]  (!%p1000_p5), %s195_s5, 8192, %s197_s9, [#allocation7], %s1257_s10, %s1257_s10, %s1258_s11  }
  0x12   : > { %s33_s12 = sadd.s32 1, %s1247_s19  ;;  %s811_s13 = sadd.s32 4294967294, %s1251_s20  }
  0x13   : > { %p35_p7 = scmp.ge.s32.totalorder %s33_s12, 2  ;;  %s40_s14 = sadd.s32 1, %s1239_s17 }
  0x14   : > { %p47_p8 = scmp.ne.s32.totalorder %s1239_s17, %s1235_s16  ;;  %p48_p9 = scmp.eq.s32.totalorder %s1251_s20, 0 }
  0x15   : > { %s1458_s12 = smov (%p35_p7, %s33_s12), 0  ;;  %p53_p10 = scmp.ne.s32.totalorder %s1235_s16, %s1231_s15 }
  0x16   : > { %s37_s23 = ssub.s32 %s1247_s19, %s1458_s12  ;;  %p150_p11 = scmp.eq.s32.totalorder %s810_s21, 1 }
  0x17   : > { %p38_p12 = scmp.eq.s32.totalorder %s37_s23, 0  ;;  %p1354_p13 = por %p1318_p1, %p53_p10 }
  0x18   : > { %p1358_p0 = por %p150_p11, %p47_p8  ;;  %p156_p2 = scmp.eq.s32.totalorder %s811_s13, 1 }
  0x19   : > { %s1363_s27 = scalar_select %p38_p12, %s1239_s17, %s40_s14  }
  0x1a   : > { %p49_p4 = por %p48_p9, %p47_p8  ;;  %p1365_p5 = por %p156_p2, %p53_p10 }
  0x1b   : > { %s213_s29 = sand.u32 1, %s1239_s17   ;;  %s817_s21 = sshll.u32 %s1247_s19, 2 }
  0x1c   : > { %p1016_p7 = scmp.lt.s32.totalorder %s1251_s20, 2  ;;  %s816_s30 = sshll.u32 %s213_s29, 2 }
  0x1d   : > { %s221_s7 = scalar_lea.hbm %s1442_s0, %s817_s21  ;;  %s217_s9 = scalar_lea.vmem [#allocation3], %s816_s30 }
  0x1e   : > { %s223_s8 = sshll.u32 %s221_s7, 4  ;;  %s225_s10 = sshll.u32 %s217_s9, 4  ;;  %s224_s8 = int_to_ptr.hbm [resolvable:$true] %s223_s8  ;;  %s226_s10 = int_to_ptr.vmem [resolvable:$true] %s225_s10 }
  0x1f   : > { %p1007_p11 = pnand %p1016_p7, %p49_p4  ;;  %s214_s11 = scalar_lea.sflag [#allocation4], %s213_s29 }
  0x20   : > { %234 = sbr.rel (%p1326_p3) target bundleno = 349 (0x15d), region = 36  ;;  %s1378_s13 = sand.u32 (!%p1326_p3), 1, %s1235_s16  }
  0x21   : > { %1009 = dma.hbm_to_vmem [thread:$0]  (!%p1007_p11), %s224_s8, 64, %s226_s10, %s214_s11  }
  0x22   : > { %s819_s14 = sshll.u32 (!%p1326_p3), %s1378_s13, 2  ;;  %s237_s23 = scalar_lea.sflag (!%p1326_p3), [#allocation4], %s1378_s13 }
  0x23   : > { %s1382_s21 = scalar_lea.vmem (!%p1326_p3), [#allocation3], %s819_s14 }
  0x25   : > { %1218 = dma.done.wait (%p1354_p13), %s237_s23, 64  }
  0x26   : > { %1220 = vsyncadd (%p1354_p13), %s237_s23, 4294967232 }
  0x27   : > { %1222 = dma.done.wait (%p1318_p1), [#allocation7], 12288  }
  0x28   : > { %1224 = vsyncadd (%p1318_p1), [#allocation7], 4294955008  ;;  %v945_v0 = vld [vmem:[#allocation6 + $0xe8] sm:$0xf]  ;;  %v986_v1 = vld [vmem:[#allocation6 + $0xf4] sm:$0xf0] }
  0x29   : > { %v984_v2 = vld [vmem:[#allocation6 + $0xec] sm:$0xf]  ;;  %v946_v3 = vor.u32 %v986_v1, %v945_v0  ;;  %v947_v4 = vld [vmem:[#allocation6 + $0xf8] sm:$0xf0]  ;;  %v937_v5 = vld [vmem:[#allocation6 + $0xe0] sm:$0xf] }
  0x2a   : > { %v985_v6 = vld [vmem:[#allocation6 + $0xec] sm:$0xf0]  ;;  %v950_v7 = vor.u32 %v984_v2, %v947_v4  ;;  %v983_v9 = vld [vmem:[#allocation6 + $0xe4] sm:$0xf]  ;;  %v939_v10 = vld [vmem:[#allocation6 + $0xf0] sm:$0xf0] }
  0x2b   : > { %v938_v8 = vor.u32 %v985_v6, %v937_v5  ;;  %v929_v11 = vld [vmem:[#allocation6 + $0xc8] sm:$0xf]  ;;  %507 = vmatpush.bf16.msra.mxu2 %v946_v3  ;;  %v942_v12 = vor.u32 %v983_v9, %v939_v10  ;;  %v982_v13 = vld [vmem:[#allocation6 + $0xd4] sm:$0xf0]  ;;  %v980_v14 = vld [vmem:[#allocation6 + $0xcc] sm:$0xf] }
  0x2c   : > { %v931_v15 = vld [vmem:[#allocation6 + $0xd8] sm:$0xf0]  ;;  %520 = vmatpush.bf16.msra.mxu3 %v950_v7  ;;  %v930_v16 = vor.u32 %v982_v13, %v929_v11  ;;  %v921_v18 = vld [vmem:[#allocation6 + $0xc0] sm:$0xf]  ;;  %v981_v19 = vld [vmem:[#allocation6 + $0xcc] sm:$0xf0] }
  0x2d   : > { %481 = vmatpush.bf16.msra.mxu0 %v938_v8  ;;  %v934_v17 = vor.u32 %v980_v14, %v931_v15  ;;  %v979_v20 = vld [vmem:[#allocation6 + $0xc4] sm:$0xf]  ;;  %494 = vmatpush.bf16.msra.mxu1 %v942_v12  ;;  %v922_v21 = vor.u32 %v981_v19, %v921_v18  ;;  %v923_v22 = vld [vmem:[#allocation6 + $0xd0] sm:$0xf0]  ;;  %v913_v23 = vld [vmem:[#allocation6 + $0xa8] sm:$0xf] }
  0x2e   : > { %v978_v24 = vld [vmem:[#allocation6 + $0xb4] sm:$0xf0]  ;;  %v926_v25 = vor.u32 %v979_v20, %v923_v22  ;;  %v976_v26 = vld [vmem:[#allocation6 + $0xac] sm:$0xf]  ;;  %v915_v27 = vld [vmem:[#allocation6 + $0xb8] sm:$0xf0] }
  0x2f   : > { %v905_v28 = vld [vmem:[#allocation6 + $0xa0] sm:$0xf]  ;;  %508 = vmatpush.bf16.msra.mxu2 %v930_v16  ;;  %v914_v29 = vor.u32 %v978_v24, %v913_v23  ;;  %v977_v30 = vld [vmem:[#allocation6 + $0xac] sm:$0xf0]  ;;  %v975_v31 = vld [vmem:[#allocation6 + $0xa4] sm:$0xf]  ;;  %v918_v33 = vor.u32 %v976_v26, %v915_v27 }
  0x30   : > { %v907_v32 = vld [vmem:[#allocation6 + $0xb0] sm:$0xf0]  ;;  %521 = vmatpush.bf16.msra.mxu3 %v934_v17  ;;  %v906_v34 = vor.u32 %v977_v30, %v905_v28  ;;  %v897_v35 = vld [vmem:[#allocation6 + $0x88] sm:$0xf]  ;;  %v974_v36 = vld [vmem:[#allocation6 + $0x94] sm:$0xf0] }
  0x31   : > { %482 = vmatpush.bf16.msra.mxu0 %v922_v21  ;;  %v972_v37 = vld [vmem:[#allocation6 + $0x8c] sm:$0xf]  ;;  %495 = vmatpush.bf16.msra.mxu1 %v926_v25  ;;  %v910_v38 = vor.u32 %v975_v31, %v907_v32  ;;  %v899_v39 = vld [vmem:[#allocation6 + $0x98] sm:$0xf0]  ;;  %v889_v40 = vld [vmem:[#allocation6 + $0x80] sm:$0xf]  ;;  %v898_v44 = vor.u32 %v974_v36, %v897_v35 }
  0x32   : > { %v973_v41 = vld [vmem:[#allocation6 + $0x8c] sm:$0xf0]  ;;  %v971_v42 = vld [vmem:[#allocation6 + $0x84] sm:$0xf]  ;;  %v891_v43 = vld [vmem:[#allocation6 + $0x90] sm:$0xf0]  ;;  %v902_v45 = vor.u32 %v972_v37, %v899_v39 }
  0x33   : > { %509 = vmatpush.bf16.msra.mxu2 %v914_v29  ;;  %v890_v46 = vor.u32 %v973_v41, %v889_v40  ;;  %v881_v47 = vld [vmem:[#allocation6 + $0x68] sm:$0xf]  ;;  %v970_v48 = vld [vmem:[#allocation6 + $0x74] sm:$0xf0]  ;;  %v968_v49 = vld [vmem:[#allocation6 + $0x6c] sm:$0xf]  ;;  %v894_v50 = vor.u32 %v971_v42, %v891_v43 }
  0x34   : > { %522 = vmatpush.bf16.msra.mxu3 %v918_v33  ;;  %v883_v51 = vld [vmem:[#allocation6 + $0x78] sm:$0xf0]  ;;  %v873_v52 = vld [vmem:[#allocation6 + $0x60] sm:$0xf]  ;;  %v969_v53 = vld [vmem:[#allocation6 + $0x6c] sm:$0xf0]  ;;  %v882_v56 = vor.u32 %v970_v48, %v881_v47 }
  0x35   : > { %483 = vmatpush.bf16.msra.mxu0 %v906_v34  ;;  %496 = vmatpush.bf16.msra.mxu1 %v910_v38  ;;  %v967_v54 = vld [vmem:[#allocation6 + $0x64] sm:$0xf]  ;;  %v875_v55 = vld [vmem:[#allocation6 + $0x70] sm:$0xf0]  ;;  %v886_v57 = vor.u32 %v968_v49, %v883_v51  ;;  %v874_v58 = vor.u32 %v969_v53, %v873_v52  ;;  %v865_v59 = vld [vmem:[#allocation6 + $0x48] sm:$0xf] }
  0x36   : > { %v966_v60 = vld [vmem:[#allocation6 + $0x54] sm:$0xf0]  ;;  %v964_v61 = vld [vmem:[#allocation6 + $0x4c] sm:$0xf]  ;;  %v878_v62 = vor.u32 %v967_v54, %v875_v55  ;;  %v867_v63 = vld [vmem:[#allocation6 + $0x58] sm:$0xf0] }
  0x37   : > { %510 = vmatpush.bf16.msra.mxu2 %v898_v44  ;;  %v857_v0 = vld [vmem:[#allocation6 + $0x40] sm:$0xf]  ;;  %v965_v1 = vld [vmem:[#allocation6 + $0x4c] sm:$0xf0]  ;;  %v963_v2 = vld [vmem:[#allocation6 + $0x44] sm:$0xf]  ;;  %v866_v4 = vor.u32 %v966_v60, %v865_v59  ;;  %v870_v5 = vor.u32 %v964_v61, %v867_v63 }
  0x38   : > { %523 = vmatpush.bf16.msra.mxu3 %v902_v45  ;;  %v859_v3 = vld [vmem:[#allocation6 + $0x50] sm:$0xf0]  ;;  %v858_v6 = vor.u32 %v965_v1, %v857_v0  ;;  %v849_v7 = vld [vmem:[#allocation6 + $0x28] sm:$0xf]  ;;  %v962_v8 = vld [vmem:[#allocation6 + $0x34] sm:$0xf0] }
  0x39   : > { %484 = vmatpush.bf16.msra.mxu0 %v890_v46  ;;  %497 = vmatpush.bf16.msra.mxu1 %v894_v50  ;;  %v960_v9 = vld [vmem:[#allocation6 + $0x2c] sm:$0xf]  ;;  %v862_v10 = vor.u32 %v963_v2, %v859_v3  ;;  %v851_v11 = vld [vmem:[#allocation6 + $0x38] sm:$0xf0]  ;;  %v841_v12 = vld [vmem:[#allocation6 + $0x20] sm:$0xf]  ;;  %v850_v16 = vor.u32 %v962_v8, %v849_v7 }
  0x3a   : > { %v961_v13 = vld [vmem:[#allocation6 + $0x2c] sm:$0xf0]  ;;  %v959_v14 = vld [vmem:[#allocation6 + $0x24] sm:$0xf]  ;;  %v843_v15 = vld [vmem:[#allocation6 + $0x30] sm:$0xf0]  ;;  %v854_v17 = vor.u32 %v960_v9, %v851_v11 }
  0x3b   : > { %511 = vmatpush.bf16.msra.mxu2 %v882_v56  ;;  %v842_v18 = vor.u32 %v961_v13, %v841_v12  ;;  %v833_v19 = vld [vmem:[#allocation6 + $0x8] sm:$0xf]  ;;  %v958_v20 = vld [vmem:[#allocation6 + $0x14] sm:$0xf0]  ;;  %v956_v21 = vld [vmem:[#allocation6 + $0xc] sm:$0xf]  ;;  %v846_v22 = vor.u32 %v959_v14, %v843_v15 }
  0x3c   : > { %524 = vmatpush.bf16.msra.mxu3 %v886_v57  ;;  %v835_v23 = vld [vmem:[#allocation6 + $0x18] sm:$0xf0]  ;;  %v825_v24 = vld [vmem:[#allocation6] sm:$0xf]  ;;  %v957_v25 = vld [vmem:[#allocation6 + $0xc] sm:$0xf0]  ;;  %v834_v28 = vor.u32 %v958_v20, %v833_v19 }
  0x3d   : > { %485 = vmatpush.bf16.msra.mxu0 %v874_v58  ;;  %498 = vmatpush.bf16.msra.mxu1 %v878_v62  ;;  %v955_v26 = vld [vmem:[#allocation6 + $0x4] sm:$0xf]  ;;  %v827_v27 = vld [vmem:[#allocation6 + $0x10] sm:$0xf0]  ;;  %v838_v29 = vor.u32 %v956_v21, %v835_v23  ;;  %v826_v30 = vor.u32 %v957_v25, %v825_v24  ;;  %v594_v32 = vld [vmem:[#allocation8 + $0x178] sm:$0xff]  ;;  %s822_s22 = sshll.u32 %s1378_s13, 3 }
  0x3e   : > { %v830_v31 = vor.u32 %v955_v26, %v827_v27  ;;  %v1393_v33 = vld [vmem:[%s1382_s21] sm:$0xf]  ;;  %v593_v35 = vld [vmem:[#allocation8 + $0x170] sm:$0xff]  ;;  %v592_v38 = vld [vmem:[#allocation8 + $0x168] sm:$0xff]  ;;  %s952_s26 = sshll.u32 %s1243_s18, 3  ;;  %s275_s7 = scalar_lea.vmem [#allocation9], %s822_s22 }
  0x3f   : > { %512 = vmatpush.bf16.msra.mxu2 %v866_v4  ;;  %v610_v34 = vld [vmem:[#allocation8 + $0x1f8] sm:$0xff]  ;;  %v609_v39 = vld [vmem:[#allocation8 + $0x1f0] sm:$0xff]  ;;  %v591_v42 = vld [vmem:[#allocation8 + $0x160] sm:$0xff]  ;;  %s704_s30 = scalar_lea.hbm %s1446_s4, %s952_s26  ;;  %s706_s8 = sshll.u32 %s275_s7, 4  ;;  %s707_s8 = int_to_ptr.vmem [resolvable:$true] %s706_s8 }
  0x40   : > { %525 = vmatpush.bf16.msra.mxu3 %v870_v5  ;;  %v562_v36 = vld [vmem:[#allocation8 + $0x78] sm:$0xff]  ;;  %v561_v40 = vld [vmem:[#allocation8 + $0x70] sm:$0xff]  ;;  %v608_v43 = vld [vmem:[#allocation8 + $0x1e8] sm:$0xff]  ;;  %s708_s9 = sshll.u32 %s704_s30, 4  ;;  %s694_s18 = scalar_lea.sflag [#allocation5], %s1378_s13  ;;  %s709_s9 = int_to_ptr.hbm [resolvable:$true] %s708_s9 }
  0x41   : > { %486 = vmatpush.bf16.msra.mxu0 %v858_v6  ;;  %499 = vmatpush.bf16.msra.mxu1 %v862_v10  ;;  %v578_v37 = vld [vmem:[#allocation8 + $0xf8] sm:$0xff]  ;;  %v577_v41 = vld [vmem:[#allocation8 + $0xf0] sm:$0xff]  ;;  %v560_v44 = vld [vmem:[#allocation8 + $0x68] sm:$0xff]  ;;  %s1179_s10 = sshra.s32 %s709_s9, 4  ;;  %s1185_s21 = scalar_lea.hbm %s1446_s4, 16  ;;  %s1180_s10 = int_to_ptr.hbm [resolvable:$true] %s1179_s10 }
  0x42   : > { %v576_v45 = vld [vmem:[#allocation8 + $0xe8] sm:$0xff]  ;;  %v590_v46 = vld [vmem:[#allocation8 + $0x158] sm:$0xff]  ;;  %v607_v47 = vld [vmem:[#allocation8 + $0x1e0] sm:$0xff]  ;;  %s1181_s11 = scalar_lea.hbm %s1180_s10, 8  ;;  %p1186_p9 = scmp.lt.s32.totalorder %s1180_s10, %s1446_s4 }
  0x43   : > { %513 = vmatpush.bf16.msra.mxu2 %v850_v16  ;;  %v559_v48 = vld [vmem:[#allocation8 + $0x60] sm:$0xff]  ;;  %v589_v50 = vld [vmem:[#allocation8 + $0x150] sm:$0xff]  ;;  %v606_v51 = vld [vmem:[#allocation8 + $0x1d8] sm:$0xff]  ;;  %p1182_p1 = scmp.ne.s32.totalorder %s1180_s10, %s1181_s11  ;;  %p1187_p10 = scmp.lt.s32.totalorder %s1185_s21, %s1181_s11 }
  0x44   : > { %526 = vmatpush.bf16.msra.mxu3 %v854_v17  ;;  %v575_v49 = vld [vmem:[#allocation8 + $0xe0] sm:$0xff]  ;;  %v558_v52 = vld [vmem:[#allocation8 + $0x58] sm:$0xff]  ;;  %v588_v54 = vld [vmem:[#allocation8 + $0x148] sm:$0xff] }
  0x45   : > { %487 = vmatpush.bf16.msra.mxu0 %v842_v18  ;;  %500 = vmatpush.bf16.msra.mxu1 %v846_v22  ;;  %v574_v53 = vld [vmem:[#allocation8 + $0xd8] sm:$0xff]  ;;  %v605_v55 = vld [vmem:[#allocation8 + $0x1d0] sm:$0xff]  ;;  %v587_v58 = vld [vmem:[#allocation8 + $0x140] sm:$0xff]  ;;  %p1183_p3 = pnand %p1182_p1, %p1358_p0  ;;  %p1188_p12 = por %p1187_p10, %p1186_p9 }
  0x46   : > { %v557_v56 = vld [vmem:[#allocation8 + $0x50] sm:$0xff]  ;;  %v604_v59 = vld [vmem:[#allocation8 + $0x1c8] sm:$0xff]  ;;  %v586_v62 = vld [vmem:[#allocation8 + $0x138] sm:$0xff] }
  0x47   : > { %514 = vmatpush.bf16.msra.mxu2 %v834_v28  ;;  %v573_v57 = vld [vmem:[#allocation8 + $0xd0] sm:$0xff]  ;;  %v556_v60 = vld [vmem:[#allocation8 + $0x48] sm:$0xff]  ;;  %v603_v63 = vld [vmem:[#allocation8 + $0x1c0] sm:$0xff]  ;;  %p1184_p8 = pneg %p1183_p3 }
  0x48   : > { %527 = vmatpush.bf16.msra.mxu3 %v838_v29  ;;  %v572_v61 = vld [vmem:[#allocation8 + $0xc8] sm:$0xff]  ;;  %v555_v0 = vld [vmem:[#allocation8 + $0x40] sm:$0xff]  ;;  %v585_v2 = vld [vmem:[#allocation8 + $0x130] sm:$0xff] }
  0x49   : > { %488 = vmatpush.bf16.msra.mxu0 %v826_v30  ;;  %501 = vmatpush.bf16.msra.mxu1 %v830_v31  ;;  %v571_v1 = vld [vmem:[#allocation8 + $0xc0] sm:$0xff]  ;;  %v602_v3 = vld [vmem:[#allocation8 + $0x1b8] sm:$0xff]  ;;  %v584_v6 = vld [vmem:[#allocation8 + $0x128] sm:$0xff]  ;;  %p1189_p13 = pnand %p1188_p12, %p1184_p8 }
  0x4a   : > { %515 = vmatmul.bf16.vlgmr.msra.gmra.mxu2 %v1393_v33  ;;  %v554_v4 = vld [vmem:[#allocation8 + $0x38] sm:$0xff]  ;;  %v601_v7 = vld [vmem:[#allocation8 + $0x1b0] sm:$0xff]  ;;  %v583_v10 = vld [vmem:[#allocation8 + $0x120] sm:$0xff] }
  0x4b   : > { %651 = vmatpush.msrb.mxu2 %v594_v32  ;;  %528 = vmatmul.bf16.vlgmr.msra.gmra.mxu3 %v1393_v33  ;;  %v570_v5 = vld [vmem:[#allocation8 + $0xb8] sm:$0xff]  ;;  %v553_v8 = vld [vmem:[#allocation8 + $0x30] sm:$0xff]  ;;  %v600_v11 = vld [vmem:[#allocation8 + $0x1a8] sm:$0xff] }
  0x4c   : > { %671 = vmatpush.msrb.mxu3 %v610_v34  ;;  %489 = vmatmul.bf16.vlgmr.msra.gmra.mxu0 %v1393_v33  ;;  %v569_v9 = vld [vmem:[#allocation8 + $0xb0] sm:$0xff]  ;;  %v552_v12 = vld [vmem:[#allocation8 + $0x28] sm:$0xff]  ;;  %v582_v14 = vld [vmem:[#allocation8 + $0x118] sm:$0xff]  ;;  %v533_v34 = vunpack.c.l.bf16 %v1393_v33 }
  0x4d   : > { %502 = vmatmul.bf16.vlgmr.msra.gmra.mxu1 %v1393_v33  ;;  %652 = vmatpush.msrb.mxu2 %v593_v35  ;;  %v568_v13 = vld [vmem:[#allocation8 + $0xa8] sm:$0xff]  ;;  %v599_v15 = vld [vmem:[#allocation8 + $0x1a0] sm:$0xff]  ;;  %v581_v18 = vld [vmem:[#allocation8 + $0x110] sm:$0xff] }
  0x4e   : > { %611 = vmatpush.msrb.mxu0 %v562_v36  ;;  %631 = vmatpush.msrb.mxu1 %v578_v37  ;;  %v551_v16 = vld [vmem:[#allocation8 + $0x20] sm:$0xff]  ;;  %v598_v19 = vld [vmem:[#allocation8 + $0x198] sm:$0xff]  ;;  %v580_v22 = vld [vmem:[#allocation8 + $0x108] sm:$0xff] }
  0x4f   : > { %653 = vmatpush.msrb.mxu2 %v592_v38  ;;  %672 = vmatpush.msrb.mxu3 %v609_v39  ;;  %v567_v17 = vld [vmem:[#allocation8 + $0xa0] sm:$0xff]  ;;  %v550_v20 = vld [vmem:[#allocation8 + $0x18] sm:$0xff]  ;;  %v597_v23 = vld [vmem:[#allocation8 + $0x190] sm:$0xff] }
  0x50   : > { %612 = vmatpush.msrb.mxu0 %v561_v40  ;;  %632 = vmatpush.msrb.mxu1 %v577_v41  ;;  %v566_v21 = vld [vmem:[#allocation8 + $0x98] sm:$0xff]  ;;  %v549_v24 = vld [vmem:[#allocation8 + $0x10] sm:$0xff]  ;;  %v579_v26 = vld [vmem:[#allocation8 + $0x100] sm:$0xff] }
  0x51   : > { %654 = vmatpush.msrb.mxu2 %v591_v42  ;;  %673 = vmatpush.msrb.mxu3 %v608_v43  ;;  %v565_v25 = vld [vmem:[#allocation8 + $0x90] sm:$0xff]  ;;  %v596_v27 = vld [vmem:[#allocation8 + $0x188] sm:$0xff]  ;;  %v595_v30 = vld [vmem:[#allocation8 + $0x180] sm:$0xff] }
  0x52   : > { %613 = vmatpush.msrb.mxu0 %v560_v44  ;;  %633 = vmatpush.msrb.mxu1 %v576_v45  ;;  %v548_v28 = vld [vmem:[#allocation8 + $0x8] sm:$0xff]  ;;  %v547_v31 = vld [vmem:[#allocation8] sm:$0xff] }
  0x53   : > { %655 = vmatpush.msrb.mxu2 %v590_v46  ;;  %674 = vmatpush.msrb.mxu3 %v607_v47  ;;  %v564_v29 = vld [vmem:[#allocation8 + $0x88] sm:$0xff]  ;;  %v563_v32 = vld [vmem:[#allocation8 + $0x80] sm:$0xff] }
  0x54   : > { %614 = vmatpush.msrb.mxu0 %v559_v48  ;;  %634 = vmatpush.msrb.mxu1 %v575_v49 }
  0x55   : > { %656 = vmatpush.msrb.mxu2 %v589_v50  ;;  %675 = vmatpush.msrb.mxu3 %v606_v51  ;;  %v1074_v51 = vld [vmem:[%s1445_s3] ss:$0 sm:$0xff] }
  0x56   : > { %615 = vmatpush.msrb.mxu0 %v558_v52  ;;  %635 = vmatpush.msrb.mxu1 %v574_v53 }
  0x57   : > { %657 = vmatpush.msrb.mxu2 %v588_v54  ;;  %676 = vmatpush.msrb.mxu3 %v605_v55 }
  0x58   : > { %616 = vmatpush.msrb.mxu0 %v557_v56  ;;  %636 = vmatpush.msrb.mxu1 %v573_v57 }
  0x59   : > { %658 = vmatpush.msrb.mxu2 %v587_v58  ;;  %677 = vmatpush.msrb.mxu3 %v604_v59 }
  0x5a   : > { %617 = vmatpush.msrb.mxu0 %v556_v60  ;;  %637 = vmatpush.msrb.mxu1 %v572_v61 }
  0x5b   : > { %659 = vmatpush.msrb.mxu2 %v586_v62  ;;  %678 = vmatpush.msrb.mxu3 %v603_v63 }
  0x5c   : > { %618 = vmatpush.msrb.mxu0 %v555_v0  ;;  %638 = vmatpush.msrb.mxu1 %v571_v1 }
  0x5d   : > { %660 = vmatpush.msrb.mxu2 %v585_v2  ;;  %679 = vmatpush.msrb.mxu3 %v602_v3 }
  0x5e   : > { %619 = vmatpush.msrb.mxu0 %v554_v4  ;;  %639 = vmatpush.msrb.mxu1 %v570_v5 }
  0x5f   : > { %661 = vmatpush.msrb.mxu2 %v584_v6  ;;  %680 = vmatpush.msrb.mxu3 %v601_v7 }
  0x60   : > { %620 = vmatpush.msrb.mxu0 %v553_v8  ;;  %640 = vmatpush.msrb.mxu1 %v569_v9 }
  0x61   : > { %662 = vmatpush.msrb.mxu2 %v583_v10  ;;  %681 = vmatpush.msrb.mxu3 %v600_v11 }
  0x62   : > { %621 = vmatpush.msrb.mxu0 %v552_v12  ;;  %641 = vmatpush.msrb.mxu1 %v568_v13 }
  0x63   : > { %663 = vmatpush.msrb.mxu2 %v582_v14  ;;  %682 = vmatpush.msrb.mxu3 %v599_v15 }
  0x64   : > { %622 = vmatpush.msrb.mxu0 %v551_v16  ;;  %642 = vmatpush.msrb.mxu1 %v567_v17 }
  0x65   : > { %664 = vmatpush.msrb.mxu2 %v581_v18  ;;  %683 = vmatpush.msrb.mxu3 %v598_v19 }
  0x66   : > { %623 = vmatpush.msrb.mxu0 %v550_v20  ;;  %643 = vmatpush.msrb.mxu1 %v566_v21 }
  0x67   : > { %665 = vmatpush.msrb.mxu2 %v580_v22  ;;  %684 = vmatpush.msrb.mxu3 %v597_v23 }
  0x68   : > { %624 = vmatpush.msrb.mxu0 %v549_v24  ;;  %644 = vmatpush.msrb.mxu1 %v565_v25 }
  0x69   : > { %666 = vmatpush.msrb.mxu2 %v579_v26  ;;  %685 = vmatpush.msrb.mxu3 %v596_v27 }
  0x6a   : > { %625 = vmatpush.msrb.mxu0 %v548_v28  ;;  %645 = vmatpush.msrb.mxu1 %v564_v29 }
  0x6b   : > { %686 = vmatpush.msrb.mxu3 %v595_v30 }
  0x6c   : > { %626 = vmatpush.msrb.mxu0 %v547_v31  ;;  %646 = vmatpush.msrb.mxu1 %v563_v32 }
  0xc9   : > { %v490_v35 = vpop.f32.mrf.mxu0 }
  0xca   : > { %v534_v36 = vmul.f32 %v533_v34, %v490_v35  ;;  %v503_v37 = vpop.f32.mrf.mxu1 }
  0xcb   : > { %v536_v38 = vmul.f32 %v533_v34, %v503_v37 }
  0xcc   : > { %627 = vmatmul.f32.vlgmr.msrb.gmra.mxu0 %v534_v36 }
  0xcd   : > { %647 = vmatmul.f32.vlgmr.msrb.gmra.mxu1 %v536_v38  ;;  %v516_v39 = vpop.f32.mrf.mxu2 }
  0xce   : > { %v538_v40 = vmul.f32 %v533_v34, %v516_v39  ;;  %v529_v41 = vpop.f32.mrf.mxu3 }
  0xcf   : > { %v540_v42 = vmul.f32 %v533_v34, %v529_v41 }
  0xd0   : > { %667 = vmatmul.f32.vlgmr.msrb.gmra.mxu2 %v538_v40 }
  0xd1   : > { %v492_v43 = vpop.f32.mrf.mxu0  ;;  %687 = vmatmul.f32.vlgmr.msrb.gmra.mxu3 %v540_v42 }
  0xd2   : > { %v505_v44 = vpop.f32.mrf.mxu1 }
  0xd5   : > { %v518_v45 = vpop.f32.mrf.mxu2 }
  0xd6   : > { %v531_v46 = vpop.f32.mrf.mxu3 }
 0x149   : > { %v628_v47 = vpop.f32.mrf.mxu0 }
 0x14a   : > { %v648_v33 = vpop.f32.mrf.mxu1 }
 0x14b   : > { %v649_v48 = vadd.f32 %v648_v33, %v628_v47 }
 0x153   : > { %v668_v49 = vpop.f32.mrf.mxu2 }
 0x154   : > { %v669_v50 = vadd.f32 %v668_v49, %v649_v48  ;;  %v688_v52 = vpop.f32.mrf.mxu3 }
 0x156   : > { %v689_v53 = vadd.f32 %v688_v52, %v669_v50 }
 0x158   : > { %v691_v54 = vadd.f32 %v1074_v51, %v689_v53 }
 0x15a   : > { %692 = vst [vmem:[%s275_s7] sm:$0xff] %v691_v54 }
 0x15b   : > { %1192 = shalt.err (!%p1189_p13)
}
 0x15c   : > { %997 = dma.vmem_to_hbm [thread:$0]  (%p1358_p0), %s707_s8, 128, %s709_s9, %s694_s18  }
 0x15d PF: > { %s720_s13 = sand.u32 1, %s1231_s15   ;;  %p1011_p2 = pnand %p815_p6, %p1365_p5 }
 0x15e   : > { %s721_s24 = scalar_lea.sflag [#allocation5], %s720_s13 }
 0x15f   : > { %p1012_p4 = pneg %p1011_p2 }
 0x161   : > { %1226 = dma.done.wait (%p1012_p4), %s721_s24, 128  }
 0x162   : > { %1228 = vsyncadd (%p1012_p4), %s721_s24, 4294967168  ;;  %s21_s20 = sadd.s32 1, %s1251_s20   ;;  %s1452_s15 = smov %s1235_s16 }
 0x163   : > { %p18_p7 = scmp.ge.s32.totalorder %s21_s20, 4   ;;  %s1453_s16 = smov %s1239_s17 }
 0x164   : > { %s1454_s17 = smov %s1363_s27  ;;  %s1455_s18 = smov %s1247_s19 }
 0x165   : > { %s1456_s19 = smov %s1458_s12  ;;  %20 = sbr.rel (!%p18_p7) target bundleno = 7 (0x7), region = 95 }
 0x16a   :  { %727 = vsyncpa [#allocation4], 1 }
 0x16b   :  { %729 = vsyncpa [#allocation4 + $0x1], 1 }
 0x16c   :  { %730 = vsyncpa [#allocation7], 1 }
 0x16d   :  { %731 = vsyncpa [#allocation5], 1 }
 0x16e   :  { %733 = vsyncpa [#allocation5 + $0x1], 1 }

</bundles_post_ra>
